<compile_context>
chip_gen: v7x
topology: tpu7x:2x2x1
jax: 0.10.0
libtpu: 0.0.40
codegen_flags: <defaults>
</compile_context>

<pallas_src>
import functools

import jax
import jax.numpy as jnp
from jax import lax
from jax.experimental import pallas as pl
from jax.experimental.pallas import tpu as pltpu


def _head_kernel(x_ref, w_ref, o_ref, *, seq_len):
    # One grid step = one batch element; leading batch dim is squeezed away.
    x = x_ref[...]                                    # (T, C)

    # Leading-dim static indexing on the stacked weight is free (no lane slicing).
    wq = w_ref[0]                                     # (C, H), pre-scaled by 1/sqrt(C)
    wk = w_ref[1]
    wv = w_ref[2]

    q = jnp.dot(x, wq, preferred_element_type=jnp.float32)   # (T, H) already scaled
    k = jnp.dot(x, wk, preferred_element_type=jnp.float32)   # (T, H)
    v = jnp.dot(x, wv, preferred_element_type=jnp.float32)   # (T, H)

    # q @ k^T contracting k's last dim directly (no explicit transposed copy;
    # any vxpose Mosaic emits lands in the XLU slot, which has slack here).
    scores = lax.dot_general(
        q, k,
        dimension_numbers=(((1,), (1,)), ((), ())),
        preferred_element_type=jnp.float32)                   # (T, T)

    # Causal mask (finite fill; exp underflows to exactly 0).
    row = lax.broadcasted_iota(jnp.int32, (seq_len, seq_len), 0)
    col = lax.broadcasted_iota(jnp.int32, (seq_len, seq_len), 1)
    scores = jnp.where(col <= row, scores, jnp.float32(-1e30))

    # Numerically-stable softmax; denom >= 1 since the diagonal is never masked.
    m = jnp.max(scores, axis=-1, keepdims=True)
    p = jnp.exp(scores - m)
    denom = jnp.sum(p, axis=-1, keepdims=True)

    # Unnormalized p @ v, then one normalization per output row.  Exact
    # reciprocal keeps f32 parity with the reference; cost is negligible here.
    ob = jnp.dot(p, v, preferred_element_type=jnp.float32)    # (T, H)
    ob = ob * pl.reciprocal(denom, approx=False)

    # TODO(synk): dropout on attention weights skipped (eval mode identity).
    o_ref[...] = ob.astype(o_ref.dtype)


def prepare_head_params(wq, wk, wv, emb_dim):
    """One-time parameter prep: stack to (3, C, H), fold 1/sqrt(C) into Wq.

    NOTE: the module scales scores by 1/sqrt(emb_dim) (== C), not
    1/sqrt(head_dim); this intentionally matches the PyTorch reference.
    """
    scale = 1.0 / (float(emb_dim) ** 0.5)
    return jnp.stack([wq * scale, wk, wv], axis=0)            # (3, C, H)


def head_forward(x, w_qkv):
    """x: (B, T, C) f32; w_qkv: (3, C, H) f32 (from prepare_head_params) -> (B, T, H)."""
    B, T, C = x.shape
    H = w_qkv.shape[-1]

    kernel = functools.partial(_head_kernel, seq_len=T)

    return pl.pallas_call(
        kernel,
        out_shape=jax.ShapeDtypeStruct((B, T, H), x.dtype),
        grid=(B,),
        in_specs=[
            # One batch element per grid step; leading dim squeezed in-kernel.
            pl.BlockSpec((pl.Squeezed(), T, C), lambda b: (b, 0, 0)),
            # Full weight slab, same block every step (stays resident in VMEM).
            pl.BlockSpec((3, C, H), lambda b: (0, 0, 0)),
        ],
        out_specs=pl.BlockSpec((pl.Squeezed(), T, H), lambda b: (b, 0, 0)),
        compiler_params=pltpu.CompilerParams(
            # Independent batch axis: shard across TensorCores on v7x (no-op on
            # single-TC v5e/v6e).
            dimension_semantics=("parallel",)),
    )(x, w_qkv)


def head_reference(x, wq, wk, wv):
    """Plain-JAX reference replicating the PyTorch forward (eval mode)."""
    B, T, C = x.shape
    q = x @ wq
    k = x @ wk
    v = x @ wv
    wei = jnp.einsum("btd,bsd->bts", q, k) / (C ** 0.5)
    mask = jnp.tril(jnp.ones((T, T), dtype=bool))
    wei = jnp.where(mask, wei, -jnp.inf)
    wei = jax.nn.softmax(wei, axis=-1)
    return jnp.einsum("bts,bsd->btd", wei, v)


if __name__ == "__main__":
    # Small shapes consistent with the module: emb_dim=32, head_dim=16,
    # block_size=8 (== T), batch=2.
    B, T, C, H = 2, 8, 32, 16

    key = jax.random.PRNGKey(0)
    kx, kq, kk, kv = jax.random.split(key, 4)

    x = jax.random.normal(kx, (B, T, C), dtype=jnp.float32)
    # Deterministic init (roughly matches torch Linear's uniform(-1/sqrt(C), 1/sqrt(C))).
    bound = 1.0 / (C ** 0.5)
    wq = jax.random.uniform(kq, (C, H), minval=-bound, maxval=bound, dtype=jnp.float32)
    wk = jax.random.uniform(kk, (C, H), minval=-bound, maxval=bound, dtype=jnp.float32)
    wv = jax.random.uniform(kv, (C, H), minval=-bound, maxval=bound, dtype=jnp.float32)

    # Parameter prep is done once (init-time), not per forward call.
    w_qkv = prepare_head_params(wq, wk, wv, C)

    out = head_forward(x, w_qkv)
    out = jax.block_until_ready(out)

    ref = head_reference(x, wq, wk, wv)
    assert out.shape == (B, T, H)
    assert jnp.allclose(out, ref, atol=1e-5, rtol=1e-5), (
        f"max abs err {jnp.max(jnp.abs(out - ref))}")

    print("KERNEL_OK")
</pallas_src>

<mosaic_0001>
module attributes {stable_mosaic.version = 11 : i64} {
  func.func @_head_kernel(%arg0: i32, %arg1: memref<1x8x32xf32, #tpu.memory_space<vmem>>, %arg2: memref<3x32x16xf32, #tpu.memory_space<vmem>>, %arg3: memref<1x8x16xf32, #tpu.memory_space<vmem>>) attributes {dimension_semantics = [#tpu.dimension_semantics<parallel>], iteration_bounds = array<i64: 2>, scalar_prefetch = 0 : i64, scratch_operands = 0 : i64, tpu.core_type = #tpu.core_type<tc>, window_params = [{transform_indices = @transform_0, window_bounds = array<i64: 1, 8, 32>}, {pipeline_mode = #tpu.pipeline_mode<synchronous>, transform_indices = @transform_1, window_bounds = array<i64: 3, 32, 16>}, {transform_indices = @transform_2, window_bounds = array<i64: 1, 8, 16>}]} {
    %c0 = arith.constant 0 : index
    %c0_0 = arith.constant 0 : index
    %c0_1 = arith.constant 0 : index
    %0 = vector.load %arg1[%c0, %c0_0, %c0_1] : memref<1x8x32xf32, #tpu.memory_space<vmem>>, vector<1x8x32xf32>
    %1 = vector.shape_cast %0 : vector<1x8x32xf32> to vector<8x32xf32>
    %c0_2 = arith.constant 0 : index
    %c0_3 = arith.constant 0 : index
    %c0_4 = arith.constant 0 : index
    %2 = vector.load %arg2[%c0_2, %c0_3, %c0_4] : memref<3x32x16xf32, #tpu.memory_space<vmem>>, vector<1x32x16xf32>
    %3 = vector.shape_cast %2 : vector<1x32x16xf32> to vector<32x16xf32>
    %c1 = arith.constant 1 : index
    %c0_5 = arith.constant 0 : index
    %c0_6 = arith.constant 0 : index
    %4 = vector.load %arg2[%c1, %c0_5, %c0_6] : memref<3x32x16xf32, #tpu.memory_space<vmem>>, vector<1x32x16xf32>
    %5 = vector.shape_cast %4 : vector<1x32x16xf32> to vector<32x16xf32>
    %c2 = arith.constant 2 : index
    %c0_7 = arith.constant 0 : index
    %c0_8 = arith.constant 0 : index
    %6 = vector.load %arg2[%c2, %c0_7, %c0_8] : memref<3x32x16xf32, #tpu.memory_space<vmem>>, vector<1x32x16xf32>
    %7 = vector.shape_cast %6 : vector<1x32x16xf32> to vector<32x16xf32>
    %cst = arith.constant dense<0.000000e+00> : vector<8x16xf32>
    %8 = tpu.matmul %1, %3, %cst {dimension_numbers = #tpu.dot_dimension_numbers<[1], [0], [0], [1], [0, 0, 1, 1], [], []>} : vector<8x32xf32>, vector<32x16xf32>, vector<8x16xf32> -> vector<8x16xf32>
    %cst_9 = arith.constant dense<0.000000e+00> : vector<8x16xf32>
    %9 = tpu.matmul %1, %5, %cst_9 {dimension_numbers = #tpu.dot_dimension_numbers<[1], [0], [0], [1], [0, 0, 1, 1], [], []>} : vector<8x32xf32>, vector<32x16xf32>, vector<8x16xf32> -> vector<8x16xf32>
    %cst_10 = arith.constant dense<0.000000e+00> : vector<8x16xf32>
    %10 = tpu.matmul %1, %7, %cst_10 {dimension_numbers = #tpu.dot_dimension_numbers<[1], [0], [0], [1], [0, 0, 1, 1], [], []>} : vector<8x32xf32>, vector<32x16xf32>, vector<8x16xf32> -> vector<8x16xf32>
    %cst_11 = arith.constant dense<0.000000e+00> : vector<8x8xf32>
    %11 = tpu.matmul %8, %9, %cst_11 {dimension_numbers = #tpu.dot_dimension_numbers<[1], [1], [0], [0], [0, 0, 1, 0], [], []>} : vector<8x16xf32>, vector<8x16xf32>, vector<8x8xf32> -> vector<8x8xf32>
    %12 = tpu.iota {dimensions = array<i32: 0>} : vector<8x8xi32>
    %13 = tpu.iota {dimensions = array<i32: 1>} : vector<8x8xi32>
    %14 = arith.cmpi sle, %13, %12 : vector<8x8xi32>
    %cst_12 = arith.constant -1.000000e+30 : f32
    %15 = vector.broadcast %cst_12 : f32 to vector<8x8xf32>
    %16 = arith.select %14, %11, %15 : vector<8x8xi1>, vector<8x8xf32>
    %cst_13 = arith.constant dense<0xFF800000> : vector<8xf32>
    %17 = vector.multi_reduction <maximumf>, %16, %cst_13 [1] : vector<8x8xf32> to vector<8xf32>
    %18 = vector.shape_cast %17 : vector<8xf32> to vector<8x1xf32>
    %19 = vector.broadcast %18 : vector<8x1xf32> to vector<8x8xf32>
    %20 = arith.subf %16, %19 : vector<8x8xf32>
    %21 = math.exp %20 : vector<8x8xf32>
    %cst_14 = arith.constant dense<0.000000e+00> : vector<8xf32>
    %22 = vector.multi_reduction <add>, %21, %cst_14 [1] : vector<8x8xf32> to vector<8xf32>
    %23 = vector.shape_cast %22 : vector<8xf32> to vector<8x1xf32>
    %cst_15 = arith.constant dense<0.000000e+00> : vector<8x16xf32>
    %24 = tpu.matmul %21, %10, %cst_15 {dimension_numbers = #tpu.dot_dimension_numbers<[1], [0], [0], [1], [0, 0, 1, 1], [], []>} : vector<8x8xf32>, vector<8x16xf32>, vector<8x16xf32> -> vector<8x16xf32>
    %25 = tpu.reciprocal %23 : vector<8x1xf32> -> vector<8x1xf32>
    %26 = vector.broadcast %25 : vector<8x1xf32> to vector<8x16xf32>
    %27 = arith.mulf %24, %26 : vector<8x16xf32>
    %c0_16 = arith.constant 0 : index
    %c0_17 = arith.constant 0 : index
    %c0_18 = arith.constant 0 : index
    %28 = vector.load %arg3[%c0_16, %c0_17, %c0_18] : memref<1x8x16xf32, #tpu.memory_space<vmem>>, vector<1x8x16xf32>
    %29 = vector.shape_cast %28 : vector<1x8x16xf32> to vector<8x16xf32>
    %30 = vector.shape_cast %27 : vector<8x16xf32> to vector<1x8x16xf32>
    tpu.vector_store %arg3[%c0_16, %c0_17, %c0_18], %30 {strides = array<i32>} : memref<1x8x16xf32, #tpu.memory_space<vmem>>, vector<1x8x16xf32>,
    return
  }
  func.func @transform_0(%arg0: i32) -> (i32, i32, i32) {
    %c0_i32 = arith.constant 0 : i32
    %c0_i32_0 = arith.constant 0 : i32
    %c0_i32_1 = arith.constant 0 : i32
    return %arg0, %c0_i32, %c0_i32_0 : i32, i32, i32
  }
  func.func @transform_1(%arg0: i32) -> (i32, i32, i32) {
    %c0_i32 = arith.constant 0 : i32
    %c0_i32_0 = arith.constant 0 : i32
    %c0_i32_1 = arith.constant 0 : i32
    %c0_i32_2 = arith.constant 0 : i32
    return %c0_i32, %c0_i32_0, %c0_i32_1 : i32, i32, i32
  }
  func.func @transform_2(%arg0: i32) -> (i32, i32, i32) {
    %c0_i32 = arith.constant 0 : i32
    %c0_i32_0 = arith.constant 0 : i32
    %c0_i32_1 = arith.constant 0 : i32
    return %arg0, %c0_i32, %c0_i32_0 : i32, i32, i32
  }
}

</mosaic_0001>

<bundles_post_ra>
// kernel: tpu_custom_call.1
= control target key start
LH: loop header
LB: loop body
LE: loop exit
PB: predicated region body
PF: predicated region fallthrough
CT: control target
= control target key end

     0   :  { %7 = vsyncpa [#allocation3], 0  ;;  %s990_s0 = inlined_call_operand.vmem [shape: f32[2,8,32], index: 0, kind: input, shape index: {}]   ;;  %s991_s1 = inlined_call_operand.vmem [shape: f32[3,32,16], index: 1, kind: input, shape index: {}]   ;;  %s992_s2 = inlined_call_operand.hbm [shape: f32[2,8,16], index: 2, kind: output, shape index: {}]  }
   0x1   :  { %9 = vsyncpa [#allocation3 + $0x1], 0  ;;  %s843_s9 = smov 0   ;;  %s845_s10 = smov 0  }
   0x2   :  { %s847_s11 = smov 0   ;;  %s849_s12 = smov 0  }
   0x3 LB: > { %s864_s13 = sadd.s32 4294967295, %s822_s12   ;;  %s610_s14 = sadd.s32 4294967294, %s822_s12   ;;  %s822_s12 = sphi %s849_s12, %s998_s12   ;;  %s818_s11 = sphi %s847_s11, %s997_s11   ;;  %s814_s10 = sphi %s845_s10, %s996_s10   ;;  %s810_s9 = sphi %s843_s9, %s995_s9  }
   0x4   : > { %s868_s15 = sadd.s32 1, %s822_s12   ;;  %s69_s16 = sadd.s32 1, %s818_s11 }
   0x5   : > { %s66_s17 = ssub.s32 %s822_s12, %s868_s15  ;;  %p79_p0 = scmp.ne.s32.totalorder %s818_s11, %s814_s10 }
   0x6   : > { %p67_p1 = scmp.eq.s32.totalorder %s66_s17, 0  ;;  %p80_p2 = scmp.eq.s32.totalorder %s864_s13, 1 }
   0x7   : > { %p85_p3 = scmp.ne.s32.totalorder %s814_s10, %s810_s9  ;;  %p86_p4 = scmp.eq.s32.totalorder %s610_s14, 1 }
   0x8   : > { %s879_s18 = scalar_select %p67_p1, %s818_s11, %s69_s16  }
   0x9   : > { %p881_p5 = por %p80_p2, %p79_p0  ;;  %p885_p6 = por %p86_p4, %p85_p3 }
   0xa   : > { %p613_p7 = scmp.ge.s32.totalorder %s822_s12, 1  ;;  %p114_p8 = scmp.lt.s32.totalorder %s822_s12, 3 }
   0xc   : > { %p115_p9 = pnand %p613_p7, %p114_p8 }
   0xd   : > { %v616_v0 = vld [vmem:[%s991_s1 + $0x20] sm:$0xff] (!%p115_p9)  ;;  %v617_v1 = vld [vmem:[%s991_s1 + $0x28] sm:$0xff] (!%p115_p9)  ;;  %v824_v3 = vmov (!%p115_p9), 0.0|0.0   ;;  %v618_v6 = vld [vmem:[%s991_s1 + $0x30] sm:$0xff] (!%p115_p9)  ;;  %p135_p10 = scmp.lt.s32.totalorder (!%p115_p9), %s864_s13, 1  ;;  %vm825_vm0 = vmmov (!%p115_p9), 0   ;;  %v445_v25 = vlaneseq (!%p115_p9) }
   0xe   : > { %118 = sbr.rel (%p115_p9) target bundleno = 840 (0x348), region = 28  ;;  %v140_v2 = vld [vmem:[%s991_s1] sm:$0xff] (!%p115_p9)  ;;  %702 = vmatprep.subr.bf16.mxu1 (!%p115_p9), %v824_v3  ;;  %v703_v4 = vpack.c.bf16 (!%p115_p9), %v617_v1, %v616_v0  ;;  %696 = vmatprep.subr.bf16.mxu0 (!%p115_p9), %v824_v3  ;;  %v141_v5 = vld [vmem:[%s991_s1 + $0x8] sm:$0xff] (!%p115_p9)  ;;  %v619_v7 = vld [vmem:[%s991_s1 + $0x38] sm:$0xff] (!%p115_p9)  ;;  %v826_v9 = vmov (!%p115_p9), 0.0   ;;  %vm154_vm1 = vcmask (!%p115_p9), 261120  }
   0xf   : > { %v697_v8 = vpack.c.bf16 (!%p115_p9), %v141_v5, %v140_v2  ;;  %672 = vmatprep.mubr.msk.f32.mxu1 (!%p115_p9), %vm825_vm0, %v826_v9  ;;  %v142_v10 = vld [vmem:[%s991_s1 + $0x10] sm:$0xff] (!%p115_p9)  ;;  %v143_v11 = vld [vmem:[%s991_s1 + $0x18] sm:$0xff] (!%p115_p9)  ;;  %661 = vmatprep.mubr.msk.f32.mxu0 (!%p115_p9), %vm825_vm0, %v826_v9  ;;  %v706_v12 = vpack.c.bf16 (!%p115_p9), %v619_v7, %v618_v6  ;;  %v620_v15 = vld [vmem:[%s991_s1 + $0x40] sm:$0xff] (!%p115_p9)  ;;  %vm368_vm2 = vcmask (!%p115_p9), 130048   ;;  %v446_v26 = vshrl.u32 (!%p115_p9), %v445_v25, 7  ;;  %s132_s3 = sand.u32 (!%p115_p9), 1, %s814_s10  }
  0x10   : > { %704 = vmatpush3.bf16.msra.mxu1 (!%p115_p9), %v703_v4  ;;  %v700_v13 = vpack.c.bf16 (!%p115_p9), %v143_v11, %v142_v10  ;;  %v621_v16 = vld [vmem:[%s991_s1 + $0x48] sm:$0xff] (!%p115_p9)  ;;  %v622_v17 = vld [vmem:[%s991_s1 + $0x50] sm:$0xff] (!%p115_p9)  ;;  %v623_v19 = vld [vmem:[%s991_s1 + $0x58] sm:$0xff] (!%p115_p9)  ;;  %v448_v27 = vand.u32 (!%p115_p9), 127, %v445_v25  ;;  %vm451_vm4 = vcmask (!%p115_p9), 64512   ;;  %s614_s4 = sshll.u32 (!%p115_p9), %s132_s3, 3 }
  0x11   : > { %698 = vmatpush3.bf16.msra.mxu0 (!%p115_p9), %v697_v8  ;;  %705 = vmatprep.subr.bf16.mxu1 (!%p115_p9), %v824_v3  ;;  %v709_v18 = vpack.c.bf16 (!%p115_p9), %v621_v16, %v620_v15  ;;  %v712_v20 = vpack.c.bf16 (!%p115_p9), %v623_v19, %v622_v17  ;;  %s631_s5 = sshll.u32 (!%p115_p9), %s864_s13, 7  ;;  %s134_s6 = scalar_lea.vmem (!%p115_p9), [#allocation2], %s614_s4 }
  0x12   : > { %699 = vmatprep.subr.bf16.mxu0 (!%p115_p9), %v824_v3  ;;  %vm449_vm3 = vcmp.le.s32.totalorder (!%p115_p9), %v448_v27, %v446_v26  ;;  %s551_s7 = sshll.u32 (!%p115_p9), %s134_s6, 4  ;;  %s538_s17 = scalar_lea.sflag (!%p115_p9), [#allocation3], %s132_s3  ;;  %s949_s7 = int_to_ptr.vmem [resolvable:$true] %s551_s7 }
  0x13   : > { %s827_s21 = smov (!%p115_p9), [#allocation2]  }
  0x14   : > { %707 = vmatpush3.bf16.msra.mxu1 (!%p115_p9), %v706_v12 }
  0x15   : > { %s136_s14 = scalar_select %p135_p10, %s864_s13, 1  ;;  %701 = vmatpush3.bf16.msra.mxu0 %v700_v13  ;;  %686 = vmatprep.subr.mxu1 %v826_v9 }
  0x16   : > { %708 = vmatprep.subr.bf16.mxu0 %v824_v3  ;;  %s760_s13 = scalar_lea.vmem %s949_s7, 128 }
  0x17   : > { %s615_s16 = sshll.u32 %s136_s14, 3  ;;  %p761_p11 = scmp.ne.s32.totalorder %s949_s7, %s760_s13 }
  0x18   : > { %s138_s22 = scalar_lea.vmem %s990_s0, %s615_s16  ;;  %s947_s16 = scalar_lea.hbm %s992_s2, %s631_s5 }
  0x19   : > { %v139_v14 = vld [vmem:[%s138_s22] sm:$0xff]  ;;  %p762_p12 = pnand %p761_p11, %p881_p5  ;;  %s764_s22 = sshll.u32 %s827_s21, 4  ;;  %s765_s22 = int_to_ptr.vmem [resolvable:$false] %s764_s22 }
  0x1a   : > { %673 = vmatmul.mubr.msk.f32.vlgmr.msra.gmra.mrb[0].mxu1 %vm154_vm1, %v139_v14  ;;  %662 = vmatmul.mubr.msk.f32.vlgmr.msra.gmra.mrb[0].mxu0 %vm154_vm1, %v139_v14  ;;  %s766_s23 = scalar_lea.vmem %s765_s22, 256  ;;  %p767_p0 = scmp.lt.s32.totalorder %s949_s7, %s765_s22 }
  0x1b   : > { %688 = vmatprep.mubr.msk.f32.mxu1 %vm825_vm0, %v826_v9  ;;  %683 = vmatprep.mubr.msk.f32.mxu0 %vm825_vm0, %v826_v9  ;;  %p763_p13 = pneg %p762_p12  ;;  %p768_p1 = scmp.lt.s32.totalorder %s766_s23, %s760_s13 }
  0x1c   : > { %710 = vmatpush3.bf16.msra.mxu0 %v709_v18 }
  0x1d   : > { %711 = vmatprep.subr.bf16.mxu0 %v824_v3  ;;  %p769_p2 = por %p768_p1, %p767_p0 }
  0x1f   : > { %p770_p3 = pnand %p769_p2, %p763_p13 }
  0x20   : > { %713 = vmatpush3.bf16.msra.mxu0 %v712_v20 }
  0x23   : > { %684 = vmatmul.mubr.msk.f32.vlgmr.msra.gmra.mrb[2].mxu0 %vm154_vm1, %v139_v14 }
  0xed   : > { %v294_v21 = vpop.f32.mrb[0].mxu1  ;;  %v224_v23 = vpop.f32.mrb[0].mxu0 }
  0xee   : > { %v674_v22 = vpop.f32.mrb[1].mxu1  ;;  %687 = vmatpush3.xpose.msk.msra.mxu1 %vm368_vm2, %v294_v21  ;;  %v663_v24 = vpop.f32.mrb[1].mxu0 }
  0xef   : > { %691 = vmatprep.subr.mxu1 %v826_v9 }
  0xf1   : > { %689 = vmatmul.mubr.msk.f32.vlgmr.msra.gmra.mrb[2].mxu1 %vm368_vm2, %v224_v23 }
  0xf2   : > { %693 = vmatprep.mubr.msk.f32.mxu1 %vm825_vm0, %v826_v9 }
  0xf6   : > { %v364_v32 = vpop.f32.mrb[2].mxu0 }
  0xf7   : > { %v685_v33 = vpop.f32.mrb[3].mxu0  ;;  %692 = vmatpush3.msra.mxu1 %v364_v32 }
 0x1c4   : > { %v441_v28 = vpop.f32.mrb[2].mxu1 }
 0x1c5   : > { %v450_v29 = vsel %vm449_vm3, %v441_v28, -1e+30  ;;  %v690_v30 = vpop.f32.mrb[3].mxu1 }
 0x1c6   : > { %v452_v31 = vsel %vm451_vm4, %v450_v29, -inf }
 0x1c7   : > { %453 = vmax.xlane.f32.xlu0 %v452_v31 }
 0x254   : > { %v454_v34 = vpop.xlane.xlu0 %453 }
 0x255   : > { %v455_v35 = vsub.f32 %v450_v29, %v454_v34 }
 0x257   : > { %v456_v36 = vmul.f32 1.442695, %v455_v35 }
 0x259   : > { %756 = vpow2.f32 %v456_v36 }
 0x263   : > { %v757_v37 = vpop.eup %756 }
 0x264   : > { %694 = vmatmul.mubr.msk.f32.vlgmr.msra.gmra.mrb[4].mxu1 %vm451_vm4, %v757_v37  ;;  %v458_v38 = vsel %vm451_vm4, %v757_v37, 0.0 }
 0x265   : > { %459 = vadd.xlane.f32.xlu0 %v458_v38 }
 0x2f2   : > { %v460_v39 = vpop.xlane.xlu0 %459 }
 0x2f3   : > { %758 = vrcp.f32 %v460_v39 }
 0x2fd   : > { %v759_v40 = vpop.eup %758 }
 0x337   : > { %v530_v41 = vpop.f32.mrb[4].mxu1 }
 0x338   : > { %v535_v42 = vmul.f32 %v759_v40, %v530_v41  ;;  %v695_v43 = vpop.f32.mrb[5].mxu1 }
 0x33a   : > { %536 = vst.msk [vmem:[%s134_s6] sm:$0xff] %vm368_vm2, %v535_v42 }
 0x33b   : > { %773 = shalt.err (!%p770_p3)
}
 0x33c   : > { %s774_s24 = scalar_lea.hbm %s947_s16, 128  ;;  %s778_s27 = scalar_lea.hbm %s992_s2, 256 }
 0x33d   : > { %p775_p4 = scmp.ne.s32.totalorder %s947_s16, %s774_s24  ;;  %p779_p9 = scmp.lt.u32.totalorder %s947_s16, %s992_s2 }
 0x33e   : > { %p780_p10 = scmp.lt.u32.totalorder %s778_s27, %s774_s24  ;;  %p782_p12 = scmp.lt.u32.totalorder %s774_s24, %s947_s16 }
 0x33f   : > { %p776_p7 = pnand %p775_p4, %p881_p5 }
 0x340   : > { %p781_p11 = por %p780_p10, %p779_p9 }
 0x341   : > { %p777_p8 = pneg %p776_p7 }
 0x342   : > { %p783_p13 = por %p782_p12, %p781_p11 }
 0x344   : > { %p784_p0 = pnand %p783_p13, %p777_p8 }
 0x346   : > { %787 = shalt.err (!%p784_p0)
}
 0x347   : > { %714 = dma.vmem_to_hbm [thread:$0]  (%p881_p5), %s949_s7, 128, %s947_s16, %s538_s17  }
 0x348 PF: > { %p720_p1 = scmp.ge.s32.totalorder %s822_s12, 2  ;;  %s563_s30 = sand.u32 1, %s810_s9  }
 0x349   : > { %s564_s3 = scalar_lea.sflag [#allocation3], %s563_s30 }
 0x34a   : > { %p717_p2 = pnand %p720_p1, %p885_p6 }
 0x34c   : > { %805 = dma.done.wait (!%p717_p2), %s564_s3, 128  }
 0x34d   : > { %807 = vsyncadd (!%p717_p2), %s564_s3, 4294967168  ;;  %p12_p3 = scmp.ge.s32.totalorder %s868_s15, 4   ;;  %s995_s9 = smov %s814_s10 }
 0x34e   : > { %s996_s10 = smov %s818_s11  ;;  %s997_s11 = smov %s879_s18 }
 0x34f   : > { %s998_s12 = smov %s868_s15  ;;  %14 = sbr.rel (!%p12_p3) target bundleno = 3 (0x3), region = 65 }
 0x356   :  { %569 = vsyncpa [#allocation3], 1 }
 0x357   :  { %571 = vsyncpa [#allocation3 + $0x1], 1 }

</bundles_post_ra>
